<compile_context>
chip_gen: v6e
topology: v6e:2x2x1
jax: 0.10.0
libtpu: 0.0.40
codegen_flags: <defaults>
</compile_context>

<pallas_src>
import jax
import jax.numpy as jnp
from jax.experimental import pallas as pl
from jax.experimental.pallas import tpu as pltpu


def _pos_enc_kernel(x_ref, w1_ref, bias_ref, w2_ref, o_ref):
    # x_ref:    (Cin, tn)  channels-first tile of positions (lanes = positions)
    # w1_ref:   (F, Cin)   conv1 weight with eval-BN scale pre-folded
    # bias_ref: (F, 2)     col0 = fused conv1-bias+BN shift, col1 = conv2 bias
    # w2_ref:   (F, F)     conv2 weight
    # o_ref:    (F, tn)    lane-dense output tile
    h = jnp.dot(w1_ref[...], x_ref[...],
                preferred_element_type=jnp.float32)            # (F, tn) MXU
    h = jnp.maximum(h + bias_ref[:, 0:1], 0.0)                 # bias+BN shift, ReLU
    z = jnp.dot(w2_ref[...], h,
                preferred_element_type=jnp.float32)            # (F, tn) MXU
    o_ref[...] = (z + bias_ref[:, 1:2]).astype(o_ref.dtype)    # conv2 bias


def _round_up(x, m):
    return ((x + m - 1) // m) * m


def position_encoding_learned(xyz, params, *, tn=2048):
    """xyz: (B, N, Cin) float32 -> (B, F, N) float32 (matches PyTorch layout)."""
    w1, b1, gamma, beta, rmean, rvar, w2, b2 = (
        params["w1"], params["b1"], params["gamma"], params["beta"],
        params["rmean"], params["rvar"], params["w2"], params["b2"],
    )
    eps = 1e-5
    B, N, Cin = xyz.shape
    F = w1.shape[0]

    # Fold eval-mode BatchNorm1d into conv1:
    #   BN(W1 @ x + b1) = (scale*W1) @ x + (scale*(b1 - rmean) + beta)
    scale = gamma / jnp.sqrt(rvar + eps)                                # (F,)
    shift = scale * (b1 - rmean) + beta                                 # (F,)
    w1_m = (w1[:, :, 0] * scale[:, None]).astype(jnp.float32)           # (F, Cin)
    w2_m = w2[:, :, 0].astype(jnp.float32)                              # (F, F)
    bias = jnp.stack([shift, b2], axis=1).astype(jnp.float32)           # (F, 2)

    # Channels-first input (cheap: Cin rows << F rows of the avoided output transpose).
    x_cf = jnp.transpose(xyz, (0, 2, 1))                                # (B, Cin, N)

    # Lane-aligned position tile; pad N so the grid divides evenly.
    tn = _round_up(max(tn, 128), 128)
    tn_eff = min(tn, _round_up(N, 128))                                 # multiple of 128
    N_pad = _round_up(N, tn_eff)
    if N_pad != N:
        x_cf = jnp.pad(x_cf, ((0, 0), (0, 0), (0, N_pad - N)))
    n_tiles = N_pad // tn_eff

    out = pl.pallas_call(
        _pos_enc_kernel,
        out_shape=jax.ShapeDtypeStruct((B, F, N_pad), xyz.dtype),
        grid_spec=pltpu.PrefetchScalarGridSpec(
            num_scalar_prefetch=0,
            grid=(B, n_tiles),
            in_specs=[
                pl.BlockSpec((None, Cin, tn_eff), lambda b, j: (b, 0, j)),  # x tile
                pl.BlockSpec((F, Cin), lambda b, j: (0, 0)),                # w1*scale (resident)
                pl.BlockSpec((F, 2), lambda b, j: (0, 0)),                  # fused biases
                pl.BlockSpec((F, F), lambda b, j: (0, 0)),                  # w2 (resident)
            ],
            out_specs=pl.BlockSpec((None, F, tn_eff), lambda b, j: (b, 0, j)),
        ),
        compiler_params=pltpu.CompilerParams(
            dimension_semantics=("parallel", "parallel"),
        ),
    )(x_cf, w1_m, bias, w2_m)

    if N_pad != N:
        out = out[:, :, :N]
    return out                                                          # (B, F, N)


def _reference(xyz, params):
    """Pure-JAX reference of the PyTorch forward (eval-mode BN), unfolded math."""
    eps = 1e-5
    w1, b1 = params["w1"][:, :, 0], params["b1"]
    w2, b2 = params["w2"][:, :, 0], params["b2"]
    x = jnp.transpose(xyz, (0, 2, 1))                                   # (B, Cin, N)
    y = jnp.einsum("oc,bcn->bon", w1, x) + b1[None, :, None]            # conv1 (k=1)
    y = (y - params["rmean"][None, :, None]) / jnp.sqrt(params["rvar"] + eps)[None, :, None]
    y = y * params["gamma"][None, :, None] + params["beta"][None, :, None]
    y = jnp.maximum(y, 0.0)
    z = jnp.einsum("of,bfn->bon", w2, y) + b2[None, :, None]            # conv2 (k=1)
    return z


def make_params(key, input_channel, num_pos_feats):
    ks = jax.random.split(key, 6)
    F, C = num_pos_feats, input_channel
    return {
        "w1": 0.1 * jax.random.normal(ks[0], (F, C, 1), jnp.float32),
        "b1": 0.1 * jax.random.normal(ks[1], (F,), jnp.float32),
        "gamma": 1.0 + 0.05 * jax.random.normal(ks[2], (F,), jnp.float32),
        "beta": 0.05 * jax.random.normal(ks[3], (F,), jnp.float32),
        "rmean": jnp.zeros((F,), jnp.float32),
        "rvar": jnp.ones((F,), jnp.float32),
        "w2": 0.1 * jax.random.normal(ks[4], (F, F, 1), jnp.float32),
        "b2": 0.1 * jax.random.normal(ks[5], (F,), jnp.float32),
    }


if __name__ == "__main__":
    key = jax.random.PRNGKey(0)
    k_x, k_p = jax.random.split(key)

    B, N, Cin, F = 2, 16, 4, 32      # small shapes consistent with the module
    xyz = jax.random.normal(k_x, (B, N, Cin), jnp.float32)
    params = make_params(k_p, Cin, F)

    out = position_encoding_learned(xyz, params)
    out = jax.block_until_ready(out)

    ref = _reference(xyz, params)
    assert out.shape == (B, F, N), out.shape
    assert jnp.allclose(out, ref, atol=1e-4, rtol=1e-4), float(jnp.max(jnp.abs(out - ref)))

    print("KERNEL_OK")
</pallas_src>

<mosaic_0001>
module attributes {stable_mosaic.version = 11 : i64} {
  func.func @_pos_enc_kernel(%arg0: i32, %arg1: i32, %arg2: memref<1x4x128xf32, #tpu.memory_space<vmem>>, %arg3: memref<32x4xf32, #tpu.memory_space<vmem>>, %arg4: memref<32x2xf32, #tpu.memory_space<vmem>>, %arg5: memref<32x32xf32, #tpu.memory_space<vmem>>, %arg6: memref<1x32x128xf32, #tpu.memory_space<vmem>>) attributes {dimension_semantics = [#tpu.dimension_semantics<parallel>, #tpu.dimension_semantics<parallel>], iteration_bounds = array<i64: 2, 1>, scalar_prefetch = 0 : i64, scratch_operands = 0 : i64, tpu.core_type = #tpu.core_type<tc>, window_params = [{transform_indices = @transform_0, window_bounds = array<i64: 1, 4, 128>}, {pipeline_mode = #tpu.pipeline_mode<synchronous>, transform_indices = @transform_1, window_bounds = array<i64: 32, 4>}, {pipeline_mode = #tpu.pipeline_mode<synchronous>, transform_indices = @transform_2, window_bounds = array<i64: 32, 2>}, {pipeline_mode = #tpu.pipeline_mode<synchronous>, transform_indices = @transform_3, window_bounds = array<i64: 32, 32>}, {transform_indices = @transform_4, window_bounds = array<i64: 1, 32, 128>}]} {
    %c0 = arith.constant 0 : index
    %c0_0 = arith.constant 0 : index
    %0 = vector.load %arg3[%c0, %c0_0] : memref<32x4xf32, #tpu.memory_space<vmem>>, vector<32x4xf32>
    %c0_1 = arith.constant 0 : index
    %c0_2 = arith.constant 0 : index
    %c0_3 = arith.constant 0 : index
    %1 = vector.load %arg2[%c0_1, %c0_2, %c0_3] : memref<1x4x128xf32, #tpu.memory_space<vmem>>, vector<1x4x128xf32>
    %2 = vector.shape_cast %1 : vector<1x4x128xf32> to vector<4x128xf32>
    %cst = arith.constant dense<0.000000e+00> : vector<32x128xf32>
    %3 = tpu.matmul %0, %2, %cst {dimension_numbers = #tpu.dot_dimension_numbers<[1], [0], [0], [1], [0, 0, 1, 1], [], []>} : vector<32x4xf32>, vector<4x128xf32>, vector<32x128xf32> -> vector<32x128xf32>
    %c0_4 = arith.constant 0 : index
    %c0_5 = arith.constant 0 : index
    %4 = vector.load %arg4[%c0_4, %c0_5] : memref<32x2xf32, #tpu.memory_space<vmem>>, vector<32x1xf32>
    %5 = vector.broadcast %4 : vector<32x1xf32> to vector<32x128xf32>
    %6 = arith.addf %3, %5 : vector<32x128xf32>
    %cst_6 = arith.constant 0.000000e+00 : f32
    %7 = vector.broadcast %cst_6 : f32 to vector<32x128xf32>
    %8 = arith.maximumf %6, %7 : vector<32x128xf32>
    %c0_7 = arith.constant 0 : index
    %c0_8 = arith.constant 0 : index
    %9 = vector.load %arg5[%c0_7, %c0_8] : memref<32x32xf32, #tpu.memory_space<vmem>>, vector<32x32xf32>
    %cst_9 = arith.constant dense<0.000000e+00> : vector<32x128xf32>
    %10 = tpu.matmul %9, %8, %cst_9 {dimension_numbers = #tpu.dot_dimension_numbers<[1], [0], [0], [1], [0, 0, 1, 1], [], []>} : vector<32x32xf32>, vector<32x128xf32>, vector<32x128xf32> -> vector<32x128xf32>
    %c0_10 = arith.constant 0 : index
    %c1 = arith.constant 1 : index
    %11 = vector.load %arg4[%c0_10, %c1] : memref<32x2xf32, #tpu.memory_space<vmem>>, vector<32x1xf32>
    %12 = vector.broadcast %11 : vector<32x1xf32> to vector<32x128xf32>
    %13 = arith.addf %10, %12 : vector<32x128xf32>
    %c0_11 = arith.constant 0 : index
    %c0_12 = arith.constant 0 : index
    %c0_13 = arith.constant 0 : index
    %14 = vector.load %arg6[%c0_11, %c0_12, %c0_13] : memref<1x32x128xf32, #tpu.memory_space<vmem>>, vector<1x32x128xf32>
    %15 = vector.shape_cast %14 : vector<1x32x128xf32> to vector<32x128xf32>
    %16 = vector.shape_cast %13 : vector<32x128xf32> to vector<1x32x128xf32>
    tpu.vector_store %arg6[%c0_11, %c0_12, %c0_13], %16 {strides = array<i32>} : memref<1x32x128xf32, #tpu.memory_space<vmem>>, vector<1x32x128xf32>,
    return
  }
  func.func @transform_0(%arg0: i32, %arg1: i32) -> (i32, i32, i32) {
    %c0_i32 = arith.constant 0 : i32
    %c0_i32_0 = arith.constant 0 : i32
    return %arg0, %c0_i32, %arg1 : i32, i32, i32
  }
  func.func @transform_1(%arg0: i32, %arg1: i32) -> (i32, i32) {
    %c0_i32 = arith.constant 0 : i32
    %c0_i32_0 = arith.constant 0 : i32
    %c0_i32_1 = arith.constant 0 : i32
    return %c0_i32, %c0_i32_0 : i32, i32
  }
  func.func @transform_2(%arg0: i32, %arg1: i32) -> (i32, i32) {
    %c0_i32 = arith.constant 0 : i32
    %c0_i32_0 = arith.constant 0 : i32
    %c0_i32_1 = arith.constant 0 : i32
    return %c0_i32, %c0_i32_0 : i32, i32
  }
  func.func @transform_3(%arg0: i32, %arg1: i32) -> (i32, i32) {
    %c0_i32 = arith.constant 0 : i32
    %c0_i32_0 = arith.constant 0 : i32
    %c0_i32_1 = arith.constant 0 : i32
    return %c0_i32, %c0_i32_0 : i32, i32
  }
  func.func @transform_4(%arg0: i32, %arg1: i32) -> (i32, i32, i32) {
    %c0_i32 = arith.constant 0 : i32
    %c0_i32_0 = arith.constant 0 : i32
    return %arg0, %c0_i32, %arg1 : i32, i32, i32
  }
}

</mosaic_0001>

<bundles_post_ra>
// kernel: tpu_custom_call.1
= control target key start
LH: loop header
LB: loop body
LE: loop exit
PB: predicated region body
PF: predicated region fallthrough
CT: control target
= control target key end

     0   :  { %9 = vsyncpa [#allocation3], 0  ;;  %s959_s0 = inlined_call_operand.vmem [shape: f32[2,4,128], index: 0, kind: input, shape index: {}]   ;;  %s960_s1 = inlined_call_operand.vmem [shape: f32[32,4], index: 1, kind: input, shape index: {}]   ;;  %s961_s2 = inlined_call_operand.vmem [shape: f32[32,2], index: 2, kind: input, shape index: {}]   ;;  %s962_s3 = inlined_call_operand.vmem [shape: f32[32,32], index: 3, kind: input, shape index: {}]   ;;  %s963_s4 = inlined_call_operand.hbm [shape: f32[2,32,128], index: 4, kind: output, shape index: {}]  }
   0x1   :  { %11 = vsyncpa [#allocation3 + $0x1], 0  ;;  %s801_s15 = smov 0   ;;  %s803_s16 = smov 0  }
   0x2   :  { %s805_s17 = smov 0   ;;  %s807_s18 = smov 0  }
   0x3   :  { %s809_s19 = smov 0   ;;  %s811_s20 = smov 0  }
   0x4 LB: > { %s565_s21 = sadd.s32 4294967295, %s769_s20   ;;  %s566_s22 = sadd.s32 4294967294, %s769_s20   ;;  %s769_s20 = sphi %s811_s20, %s17_s20   ;;  %s765_s19 = sphi %s809_s19, %s970_s19   ;;  %s761_s18 = sphi %s807_s18, %s969_s18   ;;  %s757_s17 = sphi %s805_s17, %s968_s17   ;;  %s753_s16 = sphi %s803_s16, %s967_s16   ;;  %s749_s15 = sphi %s801_s15, %s966_s15  }
   0x5   : > { %s29_s23 = sadd.s32 1, %s765_s19  ;;  %s129_s24 = sadd.s32 1, %s757_s17 }
   0x6   : > { %p31_p0 = scmp.ge.s32.totalorder %s29_s23, 2  ;;  %p139_p1 = scmp.ne.s32.totalorder %s757_s17, %s753_s16 }
   0x7   : > { %p140_p2 = scmp.eq.s32.totalorder %s565_s21, 1  ;;  %p145_p3 = scmp.ne.s32.totalorder %s753_s16, %s749_s15 }
   0x8   : > { %s972_s23 = smov (%p31_p0, %s29_s23), 0  ;;  %p146_p5 = scmp.eq.s32.totalorder %s566_s22, 1 }
   0x9   : > { %p841_p4 = por %p140_p2, %p139_p1  ;;  %s124_s26 = ssub.s32 %s765_s19, %s972_s23 }
   0xa   : > { %p569_p6 = scmp.ge.s32.totalorder %s769_s20, 1  ;;  %p127_p7 = scmp.eq.s32.totalorder %s124_s26, 0 }
   0xb   : > { %p848_p8 = por %p146_p5, %p145_p3  ;;  %p183_p9 = scmp.lt.s32.totalorder %s769_s20, 3 }
   0xc   : > { %s854_s28 = scalar_select %p127_p7, %s757_s17, %s129_s24  }
   0xd   : > { %p184_p10 = pnand %p569_p6, %p183_p9 }
   0xe   : > { %p211_p11 = scmp.lt.s32.totalorder (!%p184_p10), %s761_s18, 1  ;;  %s208_s22 = sand.u32 (!%p184_p10), 1, %s753_s16  }
   0xf   : > { %187 = sbr.rel (%p184_p10) target bundleno = 447 (0x1bf), region = 36  ;;  %s570_s24 = sshll.u32 (!%p184_p10), %s208_s22, 5 }
  0x10   : > { %s210_s26 = scalar_lea.vmem (!%p184_p10), [#allocation2], %s570_s24  ;;  %s586_s30 = sshll.u32 (!%p184_p10), %s761_s18, 9 }
  0x11   : > { %s490_s29 = sshll.u32 (!%p184_p10), %s210_s26, 4  ;;  %s912_s7 = scalar_lea.hbm (!%p184_p10), %s963_s4, %s586_s30  ;;  %s907_s29 = int_to_ptr.vmem [resolvable:$true] %s490_s29 }
  0x12   : > { %s693_s8 = scalar_lea.vmem (!%p184_p10), %s907_s29, 512 }
  0x13   : > { %p694_p12 = scmp.ne.s32.totalorder (!%p184_p10), %s907_s29, %s693_s8 }
  0x14   : > { %v218_v0 = vld [vmem:[%s960_s1] sm:$0xff]  ;;  %vm247_vm0 = vcmask 31744   ;;  %v226_v1 = vld [vmem:[%s961_s2 + $0x18] sm:$0xff]  ;;  %v224_v2 = vld [vmem:[%s961_s2 + $0x8] sm:$0xff]  ;;  %s212_s9 = scalar_select %p211_p11, %s761_s18, 1  ;;  %v771_v3 = vmov 0  }
  0x15   : > { %602 = vmatprep.mubr.msk.f32.mxu0 %vm247_vm0, %v218_v0  ;;  %690 = vset.pattern.permute.xlu1 %v771_v3  ;;  %vm260_vm1 = vcmask 1043456   ;;  %v225_v4 = vld [vmem:[%s961_s2 + $0x10] sm:$0xff]  ;;  %v223_v5 = vld [vmem:[%s961_s2] sm:$0xff]  ;;  %v219_v7 = vld [vmem:[%s960_s1 + $0x8] sm:$0xff]  ;;  %vm373_vm2 = vcmask 261120   ;;  %v772_v12 = vmov 1   ;;  %p695_p13 = pnand %p694_p12, %p841_p4 }
  0x16   : > { %689 = vset.pattern.permute.xlu0 %v771_v3  ;;  %234 = vperm.xlu1 %690, %v224_v2   ;;  %s571_s10 = sshll.u32 %s212_s9, 2  ;;  %v220_v8 = vld [vmem:[%s960_s1 + $0x10] sm:$0xff]  ;;  %v221_v9 = vld [vmem:[%s960_s1 + $0x18] sm:$0xff]  ;;  %v353_v10 = vld [vmem:[%s962_s3] sm:$0xff]  ;;  %s914_s18 = scalar_lea.sflag [#allocation3], %s208_s22 }
  0x17   : > { %244 = vperm.xlu0 %689, %v226_v1   ;;  %s217_s21 = scalar_lea.vmem %s959_s0, %s571_s10  ;;  %v355_v11 = vld [vmem:[%s962_s3 + $0x10] sm:$0xff]  ;;  %v354_v29 = vld [vmem:[%s962_s3 + $0x8] sm:$0xff]  ;;  %v356_v30 = vld [vmem:[%s962_s3 + $0x18] sm:$0xff]  ;;  %p696_p0 = pneg %p695_p13 }
  0x18   : > { %v222_v6 = vld [vmem:[%s217_s21] sm:$0xf]  ;;  %619 = vmatprep.mubr.msk.f32.mxu1 %vm373_vm2, %v355_v11  ;;  %s773_s9 = smov [#allocation2]  }
  0x19   : > { %600 = vmatprep.subr.msk.mxu0 %vm260_vm1, %v222_v6  ;;  %s697_s10 = sshll.u32 %s773_s9, 4  ;;  %s698_s10 = int_to_ptr.vmem [resolvable:$false] %s697_s10 }
  0x1a   : > { %601 = vmatpush3.msk.msra.mxu0 %vm260_vm1, %v222_v6  ;;  %229 = vperm.xlu1 %690, %v223_v5   ;;  %s699_s11 = scalar_lea.vmem %s698_s10, 1024  ;;  %p700_p1 = scmp.lt.s32.totalorder %s907_s29, %s698_s10 }
  0x1b   : > { %239 = vperm.xlu0 %689, %v225_v4   ;;  %603 = vmatmul.mubr.msk.f32.vlgmr.msra.gmra.mxu0 %vm247_vm0, %v219_v7  ;;  %p701_p2 = scmp.lt.s32.totalorder %s699_s11, %s693_s8 }
  0x1c   : > { %605 = vmatprep.mubr.msk.f32.mxu0 %vm247_vm0, %v220_v8 }
  0x1d   : > { %p702_p3 = por %p701_p2, %p700_p1 }
  0x1e   : > { %692 = vset.pattern.permute.xlu1 %v772_v12 }
  0x1f   : > { %606 = vmatmul.mubr.msk.f32.gmra.mxu0 %vm247_vm0, %v221_v9  ;;  %691 = vset.pattern.permute.xlu0 %v772_v12  ;;  %p703_p5 = pnand %p702_p3, %p696_p0 }
  0x20   : > { %616 = vmatprep.mubr.msk.f32.mxu0 %vm373_vm2, %v353_v10  ;;  %358 = vperm.xlu0 %691, %v223_v5  }
  0x21   : > { %362 = vperm.xlu1 %692, %v224_v2  }
  0x24   : > { %370 = vperm.xlu0 %691, %v226_v1  }
  0x25   : > { %366 = vperm.xlu1 %692, %v225_v4  }
  0x91   : > { %v235_v14 = vpop.permute.xlu1 %234 }
  0x92   : > { %v245_v13 = vpop.permute.xlu0 %244 }
  0x95   : > { %v230_v20 = vpop.permute.xlu1 %229 }
  0x96   : > { %v240_v18 = vpop.permute.xlu0 %239 }
  0x9b   : > { %v359_v31 = vpop.permute.xlu0 %358 }
  0x9c   : > { %v363_v32 = vpop.permute.xlu1 %362 }
  0x9f   : > { %v371_v33 = vpop.permute.xlu0 %370 }
  0xa0   : > { %v367_v36 = vpop.permute.xlu1 %366 }
  0xdb   : > { %v604_v15 = vpop.f32.mrf.mxu0 }
  0xdc   : > { %v336_v22 = vadd.f32 %v604_v15, %v235_v14 }
  0xdd   : > { %v330_v16 = vpop.f32.mrf.mxu0 }
  0xde   : > { %v331_v25 = vadd.f32 %v330_v16, %v230_v20  ;;  %v350_v27 = vmax.f32 %v336_v22, 0.0 }
  0xdf   : > { %v607_v17 = vpop.f32.mrf.mxu0 }
  0xe0   : > { %v346_v19 = vadd.f32 %v607_v17, %v245_v13  ;;  %v349_v28 = vmax.f32 %v331_v25, 0.0 }
  0xe1   : > { %v340_v21 = vpop.f32.mrf.mxu0 }
  0xe2   : > { %v352_v23 = vmax.f32 %v346_v19, 0.0  ;;  %v341_v24 = vadd.f32 %v340_v21, %v240_v18 }
  0xe4   : > { %v351_v26 = vmax.f32 %v341_v24, 0.0  ;;  %608 = vmatprep.subr.mxu0 %v352_v23  ;;  %622 = vmatprep.subr.mxu1 %v352_v23 }
  0xe5   : > { %609 = vmatpush3.msra.mxu0 %v352_v23  ;;  %626 = vmatpush3.msra.mxu1 %v352_v23 }
  0xe6   : > { %610 = vmatprep.subr.mxu0 %v351_v26  ;;  %623 = vmatprep.subr.mxu1 %v351_v26 }
  0xe7   : > { %611 = vmatpush3.msra.mxu0 %v351_v26  ;;  %627 = vmatpush3.msra.mxu1 %v351_v26 }
  0xe8   : > { %612 = vmatprep.subr.mxu0 %v350_v27  ;;  %624 = vmatprep.subr.mxu1 %v350_v27 }
  0xe9   : > { %613 = vmatpush3.msra.mxu0 %v350_v27  ;;  %628 = vmatpush3.msra.mxu1 %v350_v27 }
  0xea   : > { %614 = vmatprep.subr.mxu0 %v349_v28  ;;  %625 = vmatprep.subr.mxu1 %v349_v28 }
  0xeb   : > { %615 = vmatpush3.msra.mxu0 %v349_v28  ;;  %629 = vmatpush3.msra.mxu1 %v349_v28 }
  0xec   : > { %617 = vmatmul.mubr.msk.f32.vlgmr.msra.gmra.mxu0 %vm373_vm2, %v354_v29  ;;  %620 = vmatmul.mubr.msk.f32.vlgmr.msra.gmra.mxu1 %vm373_vm2, %v356_v30 }
 0x1ac   : > { %v618_v34 = vpop.f32.mrf.mxu0  ;;  %v621_v35 = vpop.f32.mrf.mxu1 }
 0x1ad   : > { %v458_v37 = vadd.f32 %v618_v34, %v363_v32  ;;  %v468_v38 = vadd.f32 %v621_v35, %v371_v33 }
 0x1ae   : > { %v452_v39 = vpop.f32.mrf.mxu0  ;;  %v462_v40 = vpop.f32.mrf.mxu1 }
 0x1af   : > { %472 = vst [vmem:[%s210_s26 + $0x8] sm:$0xff] %v458_v37  ;;  %474 = vst [vmem:[%s210_s26 + $0x18] sm:$0xff] %v468_v38  ;;  %v453_v41 = vadd.f32 %v452_v39, %v359_v31  ;;  %v463_v42 = vadd.f32 %v462_v40, %v367_v36 }
 0x1b1   : > { %471 = vst [vmem:[%s210_s26] sm:$0xff] %v453_v41  ;;  %473 = vst [vmem:[%s210_s26 + $0x10] sm:$0xff] %v463_v42 }
 0x1b2   : > { %706 = shalt.err (!%p703_p5)
}
 0x1b3   : > { %s707_s12 = scalar_lea.hbm %s912_s7, 512  ;;  %s711_s21 = scalar_lea.hbm %s963_s4, 1024 }
 0x1b4   : > { %p708_p6 = scmp.ne.s32.totalorder %s912_s7, %s707_s12  ;;  %p712_p10 = scmp.lt.s32.totalorder %s912_s7, %s963_s4 }
 0x1b5   : > { %p713_p11 = scmp.lt.s32.totalorder %s711_s21, %s707_s12 }
 0x1b6   : > { %p709_p7 = pnand %p708_p6, %p841_p4 }
 0x1b7   : > { %p714_p12 = por %p713_p11, %p712_p10 }
 0x1b8   : > { %p710_p9 = pneg %p709_p7 }
 0x1ba   : > { %p715_p13 = pnand %p714_p12, %p710_p9 }
 0x1bc   : > { %718 = shalt.err (!%p715_p13)
}
 0x1bd   : > { %s774_s26 = smov 128   ;;  %s775_s30 = smov 8  }
 0x1be   : > { %630 = dma.vmem_to_hbm [thread:$0]  (%p841_p4), %s907_s29, 512, %s912_s7, %s914_s18, %s774_s26, %s774_s26, %s775_s30  }
 0x1bf PF: > { %p636_p0 = scmp.ge.s32.totalorder %s769_s20, 2  ;;  %s505_s5 = sand.u32 1, %s749_s15  }
 0x1c0   : > { %s506_s6 = scalar_lea.sflag [#allocation3], %s505_s5 }
 0x1c1   : > { %p633_p1 = pnand %p636_p0, %p848_p8 }
 0x1c3   : > { %p634_p2 = pneg %p633_p1 }
 0x1c5   : > { %744 = dma.done.wait (%p634_p2), %s506_s6, 512  }
 0x1c6   : > { %746 = vsyncadd (%p634_p2), %s506_s6, 4294966784  ;;  %s17_s20 = sadd.s32 1, %s769_s20   ;;  %s966_s15 = smov %s753_s16 }
 0x1c7   : > { %p14_p3 = scmp.ge.s32.totalorder %s17_s20, 4   ;;  %s967_s16 = smov %s757_s17 }
 0x1c8   : > { %s968_s17 = smov %s854_s28  ;;  %s969_s18 = smov %s765_s19 }
 0x1c9   : > { %s970_s19 = smov %s972_s23  ;;  %16 = sbr.rel (!%p14_p3) target bundleno = 4 (0x4), region = 71 }
 0x1ce   :  { %511 = vsyncpa [#allocation3], 1 }
 0x1cf   :  { %513 = vsyncpa [#allocation3 + $0x1], 1 }

</bundles_post_ra>
